<compile_context>
chip_gen: v7x
topology: tpu7x:2x2x1
jax: 0.10.0
libtpu: 0.0.40
codegen_flags: <defaults>
</compile_context>

<pallas_src>
import functools
import math

import jax
import jax.numpy as jnp
from jax.experimental import pallas as pl
from jax.experimental.pallas import tpu as pltpu

_UNROLL_LIMIT = 64  # static-unroll threshold for in-kernel 128-lane chunk loops


# --------------------------------------------------------------------------
# helpers
# --------------------------------------------------------------------------
def _round_up(n, m):
    return ((n + m - 1) // m) * m


def _chip_params():
    """Per-generation tile target / fused-vs-tiled cutover / VMEM limit.

    Falls back to v7x-safe settings when the chip cannot be identified."""
    kind = ""
    try:
        kind = jax.devices()[0].device_kind.lower()
    except Exception:
        pass
    if ("v7" in kind) or ("7x" in kind) or ("tpu7" in kind):
        # 64 MiB VMEM, 3.2 TB/s HBM: 4 MiB tiles, modest cutover, <=48 MiB scoped.
        return dict(target_block_bytes=4 << 20, cutover_bytes=8 << 20,
                    vmem_limit_bytes=48 * 1024 * 1024)
    if "v6" in kind:
        # 128 MiB VMEM: keep work on the single-pass fused path as long as possible
        # (the two-sweep path reads x twice -> 1.5x HBM traffic).
        return dict(target_block_bytes=4 << 20, cutover_bytes=14 << 20,
                    vmem_limit_bytes=64 * 1024 * 1024)
    if "v5" in kind:
        return dict(target_block_bytes=2 << 20, cutover_bytes=12 << 20,
                    vmem_limit_bytes=64 * 1024 * 1024)
    return dict(target_block_bytes=4 << 20, cutover_bytes=8 << 20,
                vmem_limit_bytes=48 * 1024 * 1024)


def _pick_bt(B, C, l_pad, itemsize, target_block_bytes):
    """Batch rows per block: ~target-sized DMA tiles, >=2 grid steps when B >= 2
    (keeps both v7x TensorCores busy), and bt | B so every block is full."""
    per_batch = C * l_pad * itemsize
    bt = min(B, max(1, target_block_bytes // per_batch))
    if B >= 2:
        bt = min(bt, (B + 1) // 2)
    while B % bt:
        bt -= 1
    return bt


def _neg_limit(dtype):
    if jnp.issubdtype(dtype, jnp.floating):
        return jnp.asarray(-jnp.inf, dtype)
    return jnp.asarray(jnp.iinfo(dtype).min, dtype)


def _mlp_attn(avg, mx, w1f, w2f):
    """Shared MLP applied to stacked [avg; max] pooled vectors.

    avg, mx: (bt, C) f32.  w1f: (H, C) f32, w2f: (C, H) f32.  Returns (bt, C).
    Tiny matmuls — pure slack under the HBM roofline; left as-is on purpose."""
    bt = avg.shape[0]
    pooled = jnp.concatenate([avg, mx], axis=0)                      # (2*bt, C)
    h = jax.lax.dot_general(pooled, w1f, (((1,), (1,)), ((), ())),
                            preferred_element_type=jnp.float32)      # (2*bt, H)
    h = jnp.maximum(h, 0.0)
    y = jax.lax.dot_general(h, w2f, (((1,), (1,)), ((), ())),
                            preferred_element_type=jnp.float32)      # (2*bt, C)
    y = jax.nn.sigmoid(y)
    return y[:bt] + y[bt:]                                           # (bt, C)


def _tile_pool128(x_ref, *, valid_upto):
    """Lane-dense pooling of x_ref (bt, C, width) over its last axis.

    Returns (sum128 f32, max128 f32), each (bt, C, 128): elementwise (VALU)
    accumulation over 128-lane chunks read straight from the ref; the final
    cross-lane (XLU) reduce is left to the caller so it runs once per row.
    Positions >= valid_upto are zero-padded by the wrapper: they are skipped /
    masked (in the input dtype) for the max and contribute exact zeros to the
    sum.  No full-block f32 temporaries are materialized."""
    bt, C, _ = x_ref.shape
    dtype = x_ref.dtype
    neg = _neg_limit(dtype)
    n_full = valid_upto // 128
    rem = valid_upto - n_full * 128

    def load(off):
        return x_ref[:, :, pl.ds(off, 128)]                          # (bt, C, 128)

    s = jnp.zeros((bt, C, 128), jnp.float32)
    m = jnp.full((bt, C, 128), neg, dtype)

    if 0 < n_full <= _UNROLL_LIMIT:
        for k in range(n_full):                                      # static unroll
            blk = load(k * 128)
            s = s + blk.astype(jnp.float32)
            m = jnp.maximum(m, blk)
    elif n_full > _UNROLL_LIMIT:
        def body(k, carry):
            s_k, m_k = carry
            blk = load(pl.multiple_of(k * 128, 128))
            return s_k + blk.astype(jnp.float32), jnp.maximum(m_k, blk)
        s, m = jax.lax.fori_loop(0, n_full, body, (s, m))

    if rem:                                                          # ragged tail chunk
        blk = load(n_full * 128)
        lane = jax.lax.broadcasted_iota(jnp.int32, (1, 1, 128), 2)
        s = s + blk.astype(jnp.float32)                              # padded tail is zero
        m = jnp.maximum(m, jnp.where(lane < rem, blk, neg))          # mask in input dtype
    return s, m.astype(jnp.float32)


def _scale_store(x_ref, o_ref, attn_col):
    """o = attn_col * x, streamed in 128-lane chunks (lane-dense stores, no
    full-block product temporary)."""
    nchunk = x_ref.shape[-1] // 128

    def step(off):
        o_ref[:, :, pl.ds(off, 128)] = attn_col * x_ref[:, :, pl.ds(off, 128)]

    if nchunk <= _UNROLL_LIMIT:
        for k in range(nchunk):
            step(k * 128)
    else:
        @pl.loop(0, nchunk)
        def _(k):
            step(pl.multiple_of(k * 128, 128))


# --------------------------------------------------------------------------
# fused path: whole (bt, C, Lpad) slab per grid step
# --------------------------------------------------------------------------
def _cab_fused_kernel(x_ref, w1_ref, w2_ref, o_ref, *, l_valid):
    s128, m128 = _tile_pool128(x_ref, valid_upto=l_valid)
    avg = jnp.sum(s128, axis=-1) * (1.0 / l_valid)                   # one lane reduce
    mx = jnp.max(m128, axis=-1)                                      # one lane reduce
    attn = _mlp_attn(avg, mx,
                     w1_ref[...].astype(jnp.float32),
                     w2_ref[...].astype(jnp.float32))                # (bt, C) f32
    attn_col = attn.astype(o_ref.dtype)[:, :, None]                  # (bt, C, 1)
    _scale_store(x_ref, o_ref, attn_col)


def _fused_path(x, w1, w2, *, params):
    B, C, L = x.shape
    H = w1.shape[0]
    itemsize = jnp.dtype(x.dtype).itemsize
    l_pad = _round_up(L, 128)                                        # lane-dense stores
    x_p = jnp.pad(x, ((0, 0), (0, 0), (0, l_pad - L))) if l_pad != L else x

    bt = _pick_bt(B, C, l_pad, itemsize, params["target_block_bytes"])
    nb = B // bt

    kernel = functools.partial(_cab_fused_kernel, l_valid=L)
    out_p = pl.pallas_call(
        kernel,
        out_shape=jax.ShapeDtypeStruct((B, C, l_pad), x.dtype),
        grid=(nb,),
        in_specs=[
            pl.BlockSpec((bt, C, l_pad), lambda b: (b, 0, 0)),
            pl.BlockSpec((H, C), lambda b: (0, 0)),
            pl.BlockSpec((C, H), lambda b: (0, 0)),
        ],
        out_specs=pl.BlockSpec((bt, C, l_pad), lambda b: (b, 0, 0)),
        compiler_params=pltpu.CompilerParams(
            dimension_semantics=("parallel",),
            vmem_limit_bytes=params["vmem_limit_bytes"],
        ),
        cost_estimate=pl.CostEstimate(
            flops=3 * B * C * l_pad + 8 * B * C * H,
            transcendentals=2 * B * C,
            bytes_accessed=2 * B * C * l_pad * itemsize + 2 * H * C * 4,
        ),
    )(x_p, w1, w2)
    return out_p[:, :, :L] if l_pad != L else out_p


# --------------------------------------------------------------------------
# L-tiled path (long signals): sweep 1 = pooled attention, sweep 2 = rescale
# --------------------------------------------------------------------------
def _cab_pool_kernel(x_ref, w1_ref, w2_ref, attn_ref, sum_s, max_s, *,
                     l_valid, l_tile, last_tile_valid):
    li = pl.program_id(1)
    n_l = pl.num_programs(1)

    @pl.when(li == 0)
    def _():
        sum_s[...] = jnp.zeros_like(sum_s)
        max_s[...] = jnp.full_like(max_s, -jnp.inf)

    def accumulate(valid_upto):
        s, m = _tile_pool128(x_ref, valid_upto=valid_upto)
        sum_s[...] += s
        max_s[...] = jnp.maximum(max_s[...], m)

    if last_tile_valid == l_tile:
        accumulate(l_tile)                       # every tile fully valid, no masks
    else:
        @pl.when(li < n_l - 1)
        def _():
            accumulate(l_tile)                   # steady state: pure load -> reduce

        @pl.when(li == n_l - 1)
        def _():
            accumulate(last_tile_valid)          # masked max only on the ragged tail

    @pl.when(li == n_l - 1)
    def _():
        avg = jnp.sum(sum_s[...], axis=-1) * (1.0 / l_valid)         # one lane reduce
        mx = jnp.max(max_s[...], axis=-1)                            # one lane reduce
        attn = _mlp_attn(avg, mx,
                         w1_ref[...].astype(jnp.float32),
                         w2_ref[...].astype(jnp.float32))            # (1, C)
        attn_ref[...] = attn[:, None, :]                             # (1, 1, C) lane-dense


def _cab_scale_kernel(attn_ref, x_ref, o_ref):
    attn_col = attn_ref[0, 0, :].astype(o_ref.dtype)[None, :, None]  # (1, C, 1)
    _scale_store(x_ref, o_ref, attn_col)


def _l_tiled_path(x, w1, w2, *, l_tile, params):
    B, C, L = x.shape
    H = w1.shape[0]
    itemsize = jnp.dtype(x.dtype).itemsize
    l_tile = max(128, _round_up(l_tile, 128))
    l_pad = _round_up(L, l_tile)
    n_l = l_pad // l_tile
    last_tile_valid = L - (n_l - 1) * l_tile
    x_p = jnp.pad(x, ((0, 0), (0, 0), (0, l_pad - L))) if l_pad != L else x
    nb = B  # one batch row per block; the per-batch slab is already large here
    # TODO(synk): for B == 1 on v7x, additionally split the L range over a leading
    # parallel grid axis (two partial (sum, max) halves combined before the MLP) so
    # both TensorCores are used; B == 1 long signals currently run on one core.

    pool_kernel = functools.partial(_cab_pool_kernel, l_valid=L, l_tile=l_tile,
                                    last_tile_valid=last_tile_valid)
    attn = pl.pallas_call(
        pool_kernel,
        out_shape=jax.ShapeDtypeStruct((B, 1, C), jnp.float32),
        grid=(nb, n_l),
        in_specs=[
            pl.BlockSpec((1, C, l_tile), lambda b, l: (b, 0, l)),
            pl.BlockSpec((H, C), lambda b, l: (0, 0)),
            pl.BlockSpec((C, H), lambda b, l: (0, 0)),
        ],
        out_specs=pl.BlockSpec((1, 1, C), lambda b, l: (b, 0, 0)),
        scratch_shapes=[pltpu.VMEM((1, C, 128), jnp.float32),
                        pltpu.VMEM((1, C, 128), jnp.float32)],
        compiler_params=pltpu.CompilerParams(
            dimension_semantics=("parallel", "arbitrary"),
            vmem_limit_bytes=params["vmem_limit_bytes"],
        ),
        cost_estimate=pl.CostEstimate(
            flops=2 * B * C * l_pad + 8 * B * C * H,
            transcendentals=2 * B * C,
            bytes_accessed=B * C * l_pad * itemsize + 2 * H * C * 4,
        ),
    )(x_p, w1, w2)

    out_p = pl.pallas_call(
        _cab_scale_kernel,
        out_shape=jax.ShapeDtypeStruct((B, C, l_pad), x.dtype),
        grid=(nb, n_l),
        in_specs=[
            pl.BlockSpec((1, 1, C), lambda b, l: (b, 0, 0)),
            pl.BlockSpec((1, C, l_tile), lambda b, l: (b, 0, l)),
        ],
        out_specs=pl.BlockSpec((1, C, l_tile), lambda b, l: (b, 0, l)),
        compiler_params=pltpu.CompilerParams(
            dimension_semantics=("parallel", "parallel"),
            vmem_limit_bytes=params["vmem_limit_bytes"],
        ),
        cost_estimate=pl.CostEstimate(
            flops=B * C * l_pad,
            transcendentals=0,
            bytes_accessed=2 * B * C * l_pad * itemsize,
        ),
    )(attn, x_p)
    return out_p[:, :, :L] if l_pad != L else out_p


# --------------------------------------------------------------------------
# public wrapper
# --------------------------------------------------------------------------
def channel_attention_block_1d(x, w1, w2, *, force_l_tiled=False, l_tile=None):
    """x: (B, C, L); w1: (H, C); w2: (C, H).  Returns (B, C, L)."""
    B, C, L = x.shape
    params = _chip_params()
    itemsize = jnp.dtype(x.dtype).itemsize
    l_pad = _round_up(L, 128)
    per_batch_bytes = C * l_pad * itemsize
    if force_l_tiled or per_batch_bytes > params["cutover_bytes"]:
        if l_tile is None:
            l_tile = max(128, ((params["target_block_bytes"] // (C * itemsize))
                               // 128) * 128)
        return _l_tiled_path(x, w1, w2, l_tile=l_tile, params=params)
    return _fused_path(x, w1, w2, params=params)


# --------------------------------------------------------------------------
# pure-JAX reference mirroring the PyTorch forward
# --------------------------------------------------------------------------
def _reference(x, w1, w2):
    avg = jnp.mean(x, axis=-1, keepdims=True)            # (B, C, 1)
    mx = jnp.max(x, axis=-1, keepdims=True)              # (B, C, 1)

    def fc(v):
        h = jnp.einsum("hc,bco->bho", w1, v)
        h = jnp.maximum(h, 0.0)
        y = jnp.einsum("ch,bho->bco", w2, h)
        return jax.nn.sigmoid(y)

    return (fc(avg) + fc(mx)) * x


if __name__ == "__main__":
    key = jax.random.PRNGKey(0)
    kx1, kx2, kx3, kx4, k1, k2 = jax.random.split(key, 6)

    B, C, reduction_ratio = 2, 32, 16
    H = C // reduction_ratio
    bound1 = 1.0 / math.sqrt(C)
    bound2 = 1.0 / math.sqrt(H)
    w1 = jax.random.uniform(k1, (H, C), jnp.float32, -bound1, bound1)
    w2 = jax.random.uniform(k2, (C, H), jnp.float32, -bound2, bound2)

    def check(x, o, name, atol=1e-5, rtol=1e-5):
        ref = _reference(x, w1, w2)
        assert o.shape == x.shape, f"{name}: shape mismatch"
        assert jnp.allclose(o, ref, atol=atol, rtol=rtol), f"{name}: value mismatch"

    # 1) fused path, L already a multiple of 128 (static chunk loop)
    x1 = jax.random.normal(kx1, (B, C, 128), dtype=jnp.float32)
    o1 = jax.block_until_ready(channel_attention_block_1d(x1, w1, w2))
    check(x1, o1, "fused aligned")

    # 2) fused path with ragged L (wrapper padding + masked-max tail chunk)
    x2 = jax.random.normal(kx2, (B, C, 200), dtype=jnp.float32)
    o2 = jax.block_until_ready(channel_attention_block_1d(x2, w1, w2))
    check(x2, o2, "fused ragged")

    # 3) fused path with long L (exercises the fori-loop chunk accumulation +
    #    pl.loop chunked store path: 70 chunks > unroll limit)
    x3 = jax.random.normal(kx3, (B, C, 70 * 128), dtype=jnp.float32)
    o3 = jax.block_until_ready(channel_attention_block_1d(x3, w1, w2))
    check(x3, o3, "fused long", atol=3e-5, rtol=3e-5)

    # 4) long-signal (L-tiled, two-sweep) path forced at a small shape with a
    #    ragged last tile (exercises the masked last-tile branch + epilogue MLP)
    x4 = jax.random.normal(kx4, (B, C, 400), dtype=jnp.float32)
    o4 = jax.block_until_ready(
        channel_attention_block_1d(x4, w1, w2, force_l_tiled=True, l_tile=128))
    check(x4, o4, "l-tiled ragged")

    print("KERNEL_OK")
</pallas_src>

<mosaic_0001>
module attributes {stable_mosaic.version = 11 : i64} {
  func.func @_cab_fused_kernel(%arg0: i32, %arg1: memref<1x32x128xf32, #tpu.memory_space<vmem>>, %arg2: memref<2x32xf32, #tpu.memory_space<vmem>>, %arg3: memref<32x2xf32, #tpu.memory_space<vmem>>, %arg4: memref<1x32x128xf32, #tpu.memory_space<vmem>>) attributes {dimension_semantics = [#tpu.dimension_semantics<parallel>], iteration_bounds = array<i64: 2>, scalar_prefetch = 0 : i64, scratch_operands = 0 : i64, tpu.core_type = #tpu.core_type<tc>, window_params = [{transform_indices = @transform_0, window_bounds = array<i64: 1, 32, 128>}, {pipeline_mode = #tpu.pipeline_mode<synchronous>, transform_indices = @transform_1, window_bounds = array<i64: 2, 32>}, {pipeline_mode = #tpu.pipeline_mode<synchronous>, transform_indices = @transform_2, window_bounds = array<i64: 32, 2>}, {transform_indices = @transform_3, window_bounds = array<i64: 1, 32, 128>}]} {
    %cst = arith.constant 0.000000e+00 : f32
    %0 = vector.broadcast %cst : f32 to vector<1x32x128xf32>
    %cst_0 = arith.constant 0xFF800000 : f32
    %1 = vector.broadcast %cst_0 : f32 to vector<1x32x128xf32>
    %c0 = arith.constant 0 : index
    %c0_1 = arith.constant 0 : index
    %c0_2 = arith.constant 0 : index
    %2 = vector.load %arg1[%c0, %c0_1, %c0_2] : memref<1x32x128xf32, #tpu.memory_space<vmem>>, vector<1x32x128xf32>
    %3 = arith.addf %0, %2 : vector<1x32x128xf32>
    %4 = arith.maximumf %1, %2 : vector<1x32x128xf32>
    %cst_3 = arith.constant dense<0.000000e+00> : vector<1x32xf32>
    %5 = vector.multi_reduction <add>, %3, %cst_3 [2] : vector<1x32x128xf32> to vector<1x32xf32>
    %cst_4 = arith.constant 7.812500e-03 : f32
    %6 = vector.broadcast %cst_4 : f32 to vector<1x32xf32>
    %7 = arith.mulf %5, %6 : vector<1x32xf32>
    %cst_5 = arith.constant dense<0xFF800000> : vector<1x32xf32>
    %8 = vector.multi_reduction <maximumf>, %4, %cst_5 [2] : vector<1x32x128xf32> to vector<1x32xf32>
    %c0_6 = arith.constant 0 : index
    %c0_7 = arith.constant 0 : index
    %9 = vector.load %arg2[%c0_6, %c0_7] : memref<2x32xf32, #tpu.memory_space<vmem>>, vector<2x32xf32>
    %c0_8 = arith.constant 0 : index
    %c0_9 = arith.constant 0 : index
    %10 = vector.load %arg3[%c0_8, %c0_9] : memref<32x2xf32, #tpu.memory_space<vmem>>, vector<32x2xf32>
    %11 = tpu.concatenate %7, %8 in 0 : vector<1x32xf32>, vector<1x32xf32> -> vector<2x32xf32>
    %cst_10 = arith.constant dense<0.000000e+00> : vector<2x2xf32>
    %12 = tpu.matmul %11, %9, %cst_10 {dimension_numbers = #tpu.dot_dimension_numbers<[1], [1], [0], [0], [0, 0, 1, 0], [], []>} : vector<2x32xf32>, vector<2x32xf32>, vector<2x2xf32> -> vector<2x2xf32>
    %cst_11 = arith.constant 0.000000e+00 : f32
    %13 = vector.broadcast %cst_11 : f32 to vector<2x2xf32>
    %14 = arith.maximumf %12, %13 : vector<2x2xf32>
    %cst_12 = arith.constant dense<0.000000e+00> : vector<2x32xf32>
    %15 = tpu.matmul %14, %10, %cst_12 {dimension_numbers = #tpu.dot_dimension_numbers<[1], [1], [0], [0], [0, 0, 1, 0], [], []>} : vector<2x2xf32>, vector<32x2xf32>, vector<2x32xf32> -> vector<2x32xf32>
    %16 = arith.negf %15 : vector<2x32xf32>
    %17 = math.exp %16 : vector<2x32xf32>
    %cst_13 = arith.constant 1.000000e+00 : f32
    %18 = vector.broadcast %cst_13 : f32 to vector<2x32xf32>
    %19 = arith.addf %18, %17 : vector<2x32xf32>
    %20 = arith.divf %18, %19 : vector<2x32xf32>
    %21 = vector.extract_strided_slice %20 {offsets = [0, 0], sizes = [1, 32], strides = [1, 1]} : vector<2x32xf32> to vector<1x32xf32>
    %22 = vector.extract_strided_slice %20 {offsets = [1, 0], sizes = [1, 32], strides = [1, 1]} : vector<2x32xf32> to vector<1x32xf32>
    %23 = arith.addf %21, %22 : vector<1x32xf32>
    %24 = vector.shape_cast %23 : vector<1x32xf32> to vector<1x32x1xf32>
    %c0_14 = arith.constant 0 : index
    %c0_15 = arith.constant 0 : index
    %c0_16 = arith.constant 0 : index
    %25 = vector.load %arg1[%c0_14, %c0_15, %c0_16] : memref<1x32x128xf32, #tpu.memory_space<vmem>>, vector<1x32x128xf32>
    %26 = vector.broadcast %24 : vector<1x32x1xf32> to vector<1x32x128xf32>
    %27 = arith.mulf %26, %25 : vector<1x32x128xf32>
    %c0_17 = arith.constant 0 : index
    %c0_18 = arith.constant 0 : index
    %c0_19 = arith.constant 0 : index
    %28 = vector.load %arg4[%c0_17, %c0_18, %c0_19] : memref<1x32x128xf32, #tpu.memory_space<vmem>>, vector<1x32x128xf32>
    tpu.vector_store %arg4[%c0_17, %c0_18, %c0_19], %27 {strides = array<i32>} : memref<1x32x128xf32, #tpu.memory_space<vmem>>, vector<1x32x128xf32>,
    return
  }
  func.func @transform_0(%arg0: i32) -> (i32, i32, i32) {
    %c0_i32 = arith.constant 0 : i32
    %c0_i32_0 = arith.constant 0 : i32
    %c0_i32_1 = arith.constant 0 : i32
    return %arg0, %c0_i32, %c0_i32_0 : i32, i32, i32
  }
  func.func @transform_1(%arg0: i32) -> (i32, i32) {
    %c0_i32 = arith.constant 0 : i32
    %c0_i32_0 = arith.constant 0 : i32
    %c0_i32_1 = arith.constant 0 : i32
    return %c0_i32, %c0_i32_0 : i32, i32
  }
  func.func @transform_2(%arg0: i32) -> (i32, i32) {
    %c0_i32 = arith.constant 0 : i32
    %c0_i32_0 = arith.constant 0 : i32
    %c0_i32_1 = arith.constant 0 : i32
    return %c0_i32, %c0_i32_0 : i32, i32
  }
  func.func @transform_3(%arg0: i32) -> (i32, i32, i32) {
    %c0_i32 = arith.constant 0 : i32
    %c0_i32_0 = arith.constant 0 : i32
    %c0_i32_1 = arith.constant 0 : i32
    return %arg0, %c0_i32, %c0_i32_0 : i32, i32, i32
  }
}

</mosaic_0001>

<bundles_post_ra>
// kernel: tpu_custom_call.1
= control target key start
LH: loop header
LB: loop body
LE: loop exit
PB: predicated region body
PF: predicated region fallthrough
CT: control target
= control target key end

     0   :  { %8 = vsyncpa [#allocation3], 0  ;;  %s1015_s0 = inlined_call_operand.hbm [shape: f32[2,32,128], index: 0, kind: input, shape index: {}]   ;;  %s1016_s1 = inlined_call_operand.vmem [shape: f32[2,32], index: 1, kind: input, shape index: {}]   ;;  %s1017_s2 = inlined_call_operand.vmem [shape: f32[32,2], index: 2, kind: input, shape index: {}]   ;;  %s1018_s3 = inlined_call_operand.hbm [shape: f32[2,32,128], index: 3, kind: output, shape index: {}]  }
   0x1   :  { %10 = vsyncpa [#allocation3 + $0x1], 0 }
   0x2   :  { %11 = vsyncpa [#allocation4], 0 }
   0x3   :  { %13 = vsyncpa [#allocation4 + $0x1], 0  ;;  %s807_s12 = smov 0   ;;  %s809_s13 = smov 0  }
   0x4   :  { %s811_s14 = smov 0   ;;  %s813_s15 = smov 0  }
   0x5 LB: > { %s828_s16 = sadd.s32 4294967295, %s776_s15   ;;  %s568_s17 = sadd.s32 4294967294, %s776_s15   ;;  %s776_s15 = sphi %s813_s15, %s1031_s15   ;;  %s772_s14 = sphi %s811_s14, %s1030_s14   ;;  %s768_s13 = sphi %s809_s13, %s1029_s13   ;;  %s764_s12 = sphi %s807_s12, %s1028_s12  }
   0x6   : > { %s832_s18 = sadd.s32 1, %s776_s15   ;;  %s26_s19 = sadd.s32 1, %s772_s14 }
   0x7   : > { %s23_s20 = ssub.s32 %s776_s15, %s832_s18  ;;  %p33_p0 = scmp.ne.s32.totalorder %s772_s14, %s768_s13 }
   0x8   : > { %p24_p1 = scmp.eq.s32.totalorder %s23_s20, 0  ;;  %p34_p2 = scmp.eq.s32.totalorder %s776_s15, 0 }
   0x9   : > { %p39_p3 = scmp.ne.s32.totalorder %s768_s13, %s764_s12  ;;  %p40_p4 = scmp.eq.s32.totalorder %s828_s16, 0 }
   0xa   : > { %s844_s21 = scalar_select %p24_p1, %s772_s14, %s26_s19  }
   0xb   : > { %p846_p5 = por %p34_p2, %p33_p0  ;;  %p850_p6 = por %p40_p4, %p39_p3 }
   0xc   : > { %p105_p7 = scmp.eq.s32.totalorder %s828_s16, 1  ;;  %p111_p8 = scmp.eq.s32.totalorder %s568_s17, 1 }
   0xd   : > { %p635_p10 = scmp.lt.s32.totalorder %s776_s15, 2  ;;  %s137_s26 = sand.u32 1, %s772_s14  }
   0xe   : > { %p857_p11 = por %p105_p7, %p33_p0  ;;  %p861_p12 = por %p111_p8, %p39_p3 }
   0xf   : > { %s590_s27 = sshll.u32 %s776_s15, 9  ;;  %s571_s28 = sshll.u32 %s137_s26, 5 }
  0x10   : > { %s1022_s24 = scalar_select %p857_p11, 1, 0 }
  0x11   : > { %s1023_s25 = scalar_select %p861_p12, 1, 0 }
  0x12   : > { %s870_s4 = scalar_lea.hbm %s1015_s0, %s590_s27  ;;  %s141_s5 = scalar_lea.vmem [#allocation2], %s571_s28 }
  0x13   : > { %s148_s6 = sshll.u32 %s141_s5, 4  ;;  %p874_p13 = pnand %p635_p10, %p846_p5  ;;  %s878_s6 = int_to_ptr.vmem [resolvable:$true] %s148_s6 }
  0x14   : > { %s880_s8 = scalar_lea.sflag [#allocation3], %s137_s26  ;;  %s680_s9 = scalar_lea.hbm %s870_s4, 512 }
  0x15   : > { %p681_p0 = scmp.ne.s32.totalorder %s870_s4, %s680_s9  ;;  %p682_p1 = pneg %p874_p13 }
  0x16   : > { %s685_s17 = scalar_lea.hbm %s1015_s0, 1024  ;;  %p686_p4 = scmp.lt.u32.totalorder %s870_s4, %s1015_s0 }
  0x17   : > { %p683_p2 = pnand %p682_p1, %p681_p0  ;;  %p687_p5 = scmp.lt.u32.totalorder %s685_s17, %s680_s9 }
  0x18   : > { %p689_p8 = scmp.lt.u32.totalorder %s680_s9, %s870_s4 }
  0x19   : > { %p684_p3 = pneg %p683_p2  ;;  %p688_p7 = por %p687_p5, %p686_p4 }
  0x1b   : > { %p690_p10 = por %p689_p8, %p688_p7 }
  0x1d   : > { %p691_p9 = pnand %p690_p10, %p684_p3 }
  0x1f   : > { %694 = shalt.err (!%p691_p9)
}
  0x20   : > { %s695_s22 = scalar_lea.vmem %s878_s6, 512  ;;  %s778_s26 = smov [#allocation2]  }
  0x21   : > { %p696_p0 = scmp.ne.s32.totalorder %s878_s6, %s695_s22  ;;  %s700_s27 = sshll.u32 %s778_s26, 4  ;;  %s701_s27 = int_to_ptr.vmem [resolvable:$false] %s700_s27 }
  0x22   : > { %s702_s28 = scalar_lea.vmem %s701_s27, 1024  ;;  %p703_p11 = scmp.lt.s32.totalorder %s878_s6, %s701_s27 }
  0x23   : > { %p698_p2 = pnand %p696_p0, %p682_p1  ;;  %p704_p4 = scmp.lt.s32.totalorder %s702_s28, %s695_s22 }
  0x25   : > { %p699_p12 = pneg %p698_p2  ;;  %p705_p5 = por %p704_p4, %p703_p11 }
  0x27   : > { %p706_p7 = pnand %p705_p5, %p699_p12 }
  0x29   : > { %709 = shalt.err (!%p706_p7)
}
  0x2a   : > { %s779_s29 = smov 128   ;;  %s780_s30 = smov 8  }
  0x2b   : > { %630 = dma.hbm_to_vmem [thread:$0]  (!%p874_p13), %s870_s4, 512, %s878_s6, %s880_s8, %s779_s29, %s779_s29, %s780_s30  }
  0x2c   : > { %p574_p9 = scmp.ge.s32.totalorder %s776_s15, 1  ;;  %p156_p1 = scmp.lt.s32.totalorder %s776_s15, 3 }
  0x2e   : > { %p157_p3 = pnand %p574_p9, %p156_p1 }
  0x2f   : > { %s911_s5 = sand.u32 (!%p157_p3), 1, %s768_s13  }
  0x30   : > { %160 = sbr.rel (%p157_p3) target bundleno = 814 (0x32e), region = 32  ;;  %s575_s9 = sshll.u32 (!%p157_p3), %s911_s5, 5 }
  0x31   : > { %s163_s10 = scalar_lea.sflag (!%p157_p3), [#allocation3], %s911_s5  ;;  %s166_s11 = scalar_lea.vmem (!%p157_p3), [#allocation2], %s575_s9 }
  0x37   : > { %755 = dma.done.wait (%p850_p6), %s163_s10, 512  }
  0x38   : > { %757 = vsyncadd (%p850_p6), %s163_s10, 4294966784  ;;  %v921_v0 = vld [vmem:[%s166_s11 + $0x10] sm:$0xff]  ;;  %v923_v1 = vld [vmem:[%s166_s11] sm:$0xff]  ;;  %v781_v4 = vmov 0.0   ;;  %vm280_vm0 = vcmask 261120   ;;  %vm782_vm1 = vmmov 0   ;;  %v226_v13 = vlaneseq }
  0x39   : > { %201 = vadd.xlane.f32.xlu1 %v921_v0  ;;  %197 = vadd.xlane.f32.xlu0 %v923_v1  ;;  %v927_v2 = vld [vmem:[%s166_s11 + $0x18] sm:$0xff]  ;;  %v929_v3 = vld [vmem:[%s166_s11 + $0x8] sm:$0xff]  ;;  %v217_v5 = vld [vmem:[%s1016_s1] sm:$0x3]  ;;  %vm358_vm2 = vcmask 15360   ;;  %v783_v8 = vmov 0.0|0.0  }
  0x3a   : > { %599 = vmatprep.subr.mxu0 %v781_v4  ;;  %601 = vmatprep.mubr.msk.f32.mxu0 %vm782_vm1, %v781_v4  ;;  %v218_v6 = vld [vmem:[%s1017_s2] sm:$0xff]  ;;  %v219_v7 = vld [vmem:[%s1017_s2 + $0x8] sm:$0xff]  ;;  %vm617_vm3 = vmpackc.low %vm358_vm2, %vm358_vm2  ;;  %v227_v14 = vand.u32 127, %v226_v13  ;;  %v229_v16 = vshrl.u32 %v226_v13, 7  ;;  %vm237_vm4 = vcmask 130112   ;;  %vm244_vm5 = vcmask 195712  }
  0x3b   : > { %600 = vmatpush3.xpose.msk.msra.mxu0 %vm280_vm0, %v217_v5  ;;  %612 = vmatprep.mubr.msk.f32.mxu1 %vm782_vm1, %v781_v4  ;;  %v616_v9 = vpack.c.bf16 %v219_v7, %v218_v6  ;;  %v220_v10 = vld [vmem:[%s1017_s2 + $0x10] sm:$0xff]  ;;  %v221_v11 = vld [vmem:[%s1017_s2 + $0x18] sm:$0xff]  ;;  %vm251_vm6 = vcmask 261312   ;;  %vm278_vm7 = vcmask 1040384   ;;  %s188_s27 = scalar_lea.vmem [#allocation5], %s575_s9  ;;  %s591_s29 = sshll.u32 %s828_s16, 9 }
  0x3c   : > { %615 = vmatprep.subr.bf16.mxu1 %v783_v8  ;;  %v620_v12 = vpack.c.bf16 %v221_v11, %v220_v10  ;;  %v232_v15 = vadd.s32 4294967288, %v227_v14  ;;  %v239_v19 = vadd.s32 4294967280, %v227_v14  ;;  %v230_v21 = vsub.s32 %v227_v14, %v229_v16  ;;  %s495_s28 = sshll.u32 %s188_s27, 4  ;;  %s970_s11 = scalar_lea.hbm %s1018_s3, %s591_s29  ;;  %s965_s28 = int_to_ptr.vmem [resolvable:$true] %s495_s28 }
  0x3d   : > { %203 = vadd.xlane.f32.xlu1 %v927_v2  ;;  %199 = vadd.xlane.f32.xlu0 %v929_v3  ;;  %v246_v23 = vadd.s32 4294967272, %v227_v14  ;;  %v456_v60 = vsub.s32 0, %v229_v16  ;;  %s482_s9 = scalar_lea.sflag [#allocation4], %s911_s5  ;;  %s710_s23 = scalar_lea.vmem %s965_s28, 512 }
  0x3e   : > { %618 = vmatpush3.bf16.xpose.msk.msra.mxu1 %vm617_vm3, %v616_v9  ;;  %v235_v20 = vsub.s32 %v232_v15, %v229_v16  ;;  %v242_v27 = vsub.s32 %v239_v19, %v229_v16  ;;  %p711_p6 = scmp.ne.s32.totalorder %s965_s28, %s710_s23  ;;  %p1025_p11 = scmp.ne.s32.totalorder %s1022_s24, 0 }
  0x3f   : > { %619 = vmatprep.subr.bf16.mxu1 %v783_v8  ;;  %v249_v31 = vsub.s32 %v246_v23, %v229_v16  ;;  %s784_s16 = smov [#allocation5]  }
  0x40   : > { %p712_p12 = pnand %p711_p6, %p1025_p11  ;;  %s714_s4 = sshll.u32 %s784_s16, 4  ;;  %s715_s4 = int_to_ptr.vmem [resolvable:$false] %s714_s4 }
  0x41   : > { %211 = vmax.xlane.f32.xlu1 %v929_v3  ;;  %209 = vmax.xlane.f32.xlu0 %v923_v1  ;;  %s716_s6 = scalar_lea.vmem %s715_s4, 1024  ;;  %p717_p8 = scmp.lt.s32.totalorder %s965_s28, %s715_s4 }
  0x42   : > { %p713_p13 = pneg %p712_p12  ;;  %p718_p10 = scmp.lt.s32.totalorder %s716_s6, %s710_s23 }
  0x44   : > { %p719_p0 = por %p718_p10, %p717_p8 }
  0x45   : > { %213 = vmax.xlane.f32.xlu0 %v921_v0  ;;  %215 = vmax.xlane.f32.xlu1 %v927_v2 }
  0x46   : > { %622 = vmatpush3.bf16.xpose.msk.msra.mxu1 %vm617_vm3, %v620_v12  ;;  %p720_p2 = pnand %p719_p0, %p713_p13 }
  0xc6   : > { %v202_v17 = vpop.xlane.xlu1 %201  ;;  %v198_v18 = vpop.xlane.xlu0 %197 }
  0xc7   : > { %v205_v22 = vmul.f32 0.0078125, %v198_v18  ;;  %v207_v28 = vmul.f32 0.0078125, %v202_v17 }
  0xc9   : > { %v231_v30 = vrot.slane %v205_v22, %v230_v21  ;;  %v243_v38 = vrot.slane %v207_v28, %v242_v27 }
  0xca   : > { %v204_v24 = vpop.xlane.xlu1 %203  ;;  %v200_v25 = vpop.xlane.xlu0 %199 }
  0xcb   : > { %v206_v26 = vmul.f32 0.0078125, %v200_v25  ;;  %v208_v32 = vmul.f32 0.0078125, %v204_v24 }
  0xcd   : > { %v236_v29 = vrot.slane %v206_v26, %v235_v20  ;;  %v250_v39 = vrot.slane %v208_v32, %v249_v31 }
  0xce   : > { %v212_v33 = vpop.xlane.xlu1 %211  ;;  %v210_v34 = vpop.xlane.xlu0 %209 }
  0xcf   : > { %v238_v35 = vsel %vm237_vm4, %v236_v29, %v231_v30  ;;  %v265_v36 = vrot.slane %v212_v33, %v235_v20  ;;  %v261_v37 = vrot.slane %v210_v34, %v230_v21 }
  0xd0   : > { %v245_v44 = vsel %vm244_vm5, %v243_v38, %v238_v35 }
  0xd1   : > { %v266_v45 = vsel %vm237_vm4, %v265_v36, %v261_v37  ;;  %v252_v48 = vsel %vm251_vm6, %v250_v39, %v245_v44 }
  0xd2   : > { %v214_v40 = vpop.xlane.xlu0 %213  ;;  %v216_v41 = vpop.xlane.xlu1 %215 }
  0xd3   : > { %v270_v42 = vrot.slane %v214_v40, %v242_v27  ;;  %v275_v43 = vrot.slane %v216_v41, %v249_v31 }
  0xd5   : > { %v271_v46 = vsel %vm244_vm5, %v270_v42, %v266_v45 }
  0xd6   : > { %v276_v47 = vsel %vm251_vm6, %v275_v43, %v271_v46 }
  0xd7   : > { %v279_v49 = vsel %vm278_vm7, %v252_v48, %v276_v47 }
  0xd8   : > { %602 = vmatmul.mubr.msk.f32.vlgmr.msra.gmra.mrb[0].mxu0 %vm280_vm0, %v279_v49 }
 0x1ab   : > { %v353_v50 = vpop.f32.mrb[0].mxu0 }
 0x1ac   : > { %v357_v51 = vmax.f32 %v353_v50, 0.0  ;;  %v603_v52 = vpop.f32.mrb[1].mxu0 }
 0x1ae   : > { %613 = vmatmul.mubr.msk.f32.vlgmr.msra.gmra.mrb[0].mxu1 %vm358_vm2, %v357_v51 }
 0x281   : > { %v440_v53 = vpop.f32.mrb[0].mxu1 }
 0x282   : > { %v584_v54 = vmul.f32 -1.442695, %v440_v53  ;;  %v614_v55 = vpop.f32.mrb[1].mxu1 }
 0x284   : > { %676 = vpow2.f32 %v584_v54 }
 0x28e   : > { %v677_v56 = vpop.eup %676 }
 0x28f   : > { %v447_v57 = vadd.f32 1.0, %v677_v56 }
 0x291   : > { %678 = vrcp.f32 %v447_v57 }
 0x29b   : > { %v679_v58 = vpop.eup %678 }
 0x29c   : > { %v451_v59 = vrot.slane %v679_v58, 1 }
 0x29e   : > { %v453_v61 = vadd.f32 %v679_v58, %v451_v59 }
 0x2a0   : > { %v457_v62 = vrot.slane %v453_v61, %v456_v60 }
 0x2a2   : > { %463 = vbcast.lane.b32.xlu1 %v457_v62, 264  ;;  %459 = vbcast.lane.b32.xlu0 %v457_v62, 256 }
 0x2a6   : > { %467 = vbcast.lane.b32.xlu1 %v457_v62, 272 }
 0x2aa   : > { %471 = vbcast.lane.b32.xlu1 %v457_v62, 280 }
 0x314   : > { %v464_v63 = vpop.permute.xlu1 %463  ;;  %v460_v4 = vpop.permute.xlu0 %459 }
 0x315   : > { %v474_v5 = vmul.f32 %v464_v63, %v929_v3  ;;  %v473_v6 = vmul.f32 %v460_v4, %v923_v1 }
 0x317   : > { %478 = vst [vmem:[%s188_s27 + $0x8] sm:$0xff] %v474_v5  ;;  %477 = vst [vmem:[%s188_s27] sm:$0xff] %v473_v6 }
 0x318   : > { %v468_v7 = vpop.permute.xlu1 %467 }
 0x319   : > { %v475_v8 = vmul.f32 %v468_v7, %v921_v0 }
 0x31b   : > { %479 = vst [vmem:[%s188_s27 + $0x10] sm:$0xff] %v475_v8 }
 0x31c   : > { %v472_v9 = vpop.permute.xlu1 %471 }
 0x31d   : > { %v476_v1 = vmul.f32 %v472_v9, %v927_v2 }
 0x31f   : > { %480 = vst [vmem:[%s188_s27 + $0x18] sm:$0xff] %v476_v1 }
 0x320   : > { %723 = shalt.err (!%p720_p2)
}
 0x321   : > { %s724_s7 = scalar_lea.hbm %s970_s11, 512  ;;  %s728_s19 = scalar_lea.hbm %s1018_s3, 1024 }
 0x322   : > { %p725_p4 = scmp.ne.s32.totalorder %s970_s11, %s724_s7  ;;  %p729_p9 = scmp.lt.u32.totalorder %s970_s11, %s1018_s3 }
 0x323   : > { %p730_p1 = scmp.lt.u32.totalorder %s728_s19, %s724_s7  ;;  %p732_p6 = scmp.lt.u32.totalorder %s724_s7, %s970_s11 }
 0x324   : > { %p726_p5 = pnand %p725_p4, %p1025_p11 }
 0x325   : > { %p731_p3 = por %p730_p1, %p729_p9 }
 0x326   : > { %p727_p7 = pneg %p726_p5 }
 0x327   : > { %p733_p12 = por %p732_p6, %p731_p3 }
 0x329   : > { %p734_p13 = pnand %p733_p12, %p727_p7 }
 0x32b   : > { %737 = shalt.err (!%p734_p13)
}
 0x32c   : > { %s785_s26 = smov 128   ;;  %s786_s27 = smov 8  }
 0x32d   : > { %625 = dma.vmem_to_hbm [thread:$0]  (%p1025_p11), %s965_s28, 512, %s970_s11, %s482_s9, %s785_s26, %s785_s26, %s786_s27  }
 0x32e PF: > { %s510_s29 = sand.u32 1, %s764_s12   ;;  %p1026_p8 = scmp.ne.s32.totalorder %s1023_s25, 0 }
 0x32f   : > { %p1027_p10 = scmp.ge.s32.totalorder %s776_s15, 2  ;;  %s511_s30 = scalar_lea.sflag [#allocation4], %s510_s29 }
 0x331   : > { %p632_p0 = pnand %p1027_p10, %p1026_p8 }
 0x333   : > { %759 = dma.done.wait (!%p632_p0), %s511_s30, 512  }
 0x334   : > { %761 = vsyncadd (!%p632_p0), %s511_s30, 4294966784  ;;  %p16_p2 = scmp.ge.s32.totalorder %s832_s18, 4   ;;  %s1028_s12 = smov %s768_s13 }
 0x335   : > { %s1029_s13 = smov %s772_s14  ;;  %s1030_s14 = smov %s844_s21 }
 0x336   : > { %s1031_s15 = smov %s832_s18  ;;  %18 = sbr.rel (!%p16_p2) target bundleno = 5 (0x5), region = 77 }
 0x33d   :  { %516 = vsyncpa [#allocation3], 1 }
 0x33e   :  { %518 = vsyncpa [#allocation3 + $0x1], 1 }
 0x33f   :  { %519 = vsyncpa [#allocation4], 1 }
 0x340   :  { %521 = vsyncpa [#allocation4 + $0x1], 1 }

</bundles_post_ra>
